<compile_context>
chip_gen: v6e
topology: v6e:2x2x1
jax: 0.10.0
libtpu: 0.0.40
codegen_flags: <defaults>
</compile_context>

<pallas_src>
import re

import jax
import jax.numpy as jnp
from jax.experimental import pallas as pl
from jax.experimental.pallas import tpu as pltpu


LANE = 128
_COL_CANDIDATES = (4096, 2048, 1024, 512, 256, 128)   # lane-wide slab widths


def _round_up(x: int, m: int) -> int:
    return (x + m - 1) // m * m


def _tpu_generation() -> int:
    """Best-effort TPU generation from device_kind ('TPU v5 lite' -> 5)."""
    try:
        kind = jax.devices()[0].device_kind.lower()
    except Exception:
        return 0
    m = re.search(r"v(\d+)", kind)
    return int(m.group(1)) if m else 0


def _target_block_bytes(gen: int) -> int:
    # Per-buffer block bytes.  With double-buffered in+out this is ~4x live.
    if gen >= 7:
        return 8 << 20      # 3.2 TB/s HBM: amortize the ~0.35us/step fixed cost
    if gen == 6:
        return 8 << 20      # 32 MiB live, well under the raised 64 MiB limit
    if gen == 5:
        return 4 << 20      # 16 MiB live, under the raised 32 MiB limit
    return 2 << 20          # unknown / older gens: stay inside default scoped VMEM


def _compiler_params(gen: int, n_steps: int) -> pltpu.CompilerParams:
    if gen >= 7:
        # Explicit core-level parallelism: plain "parallel" does not reliably
        # shard the grid across the two v7x TensorCores.
        sem = pltpu.CORE_PARALLEL if n_steps >= 2 else "parallel"
        return pltpu.CompilerParams(dimension_semantics=(sem,),
                                    vmem_limit_bytes=48 << 20)
    if gen == 6:
        return pltpu.CompilerParams(dimension_semantics=("parallel",),
                                    vmem_limit_bytes=64 << 20)
    if gen == 5:
        return pltpu.CompilerParams(dimension_semantics=("parallel",),
                                    vmem_limit_bytes=32 << 20)
    return pltpu.CompilerParams(dimension_semantics=("parallel",))


def _scale_kernel(scale_ref, x_ref, o_ref):
    # scale_ref: SMEM (1,) float32 scalar; x_ref / o_ref: VMEM tiles.
    if jnp.issubdtype(x_ref.dtype, jnp.floating):
        # Multiply in the native dtype (bf16 VALU on v6e/v7x); avoids an
        # f32 upcast + downcast per vreg.  Differs from f32-multiply by at
        # most one ULP of the narrow dtype.
        s = scale_ref[0].astype(x_ref.dtype)
        o_ref[...] = x_ref[...] * s
    else:
        # TODO(synk): integer inputs truncate on the final cast; the PyTorch
        # module only ever uses float tensors.
        o_ref[...] = (x_ref[...].astype(jnp.float32) * scale_ref[0]).astype(o_ref.dtype)


def _scale_2d(x2d: jax.Array, scale_f32: jax.Array, *, gen: int,
              donate_input: bool = False) -> jax.Array:
    """Main path: lane-dense (rows, cols) slab, contiguous row-block DMAs."""
    rows, cols = x2d.shape
    itemsize = jnp.dtype(x2d.dtype).itemsize
    sub = max(8, 32 // itemsize)          # packed-sublane multiple: 8 f32 / 16 bf16 / 32 i8
    row_bytes = cols * itemsize

    tm = max(sub, (_target_block_bytes(gen) // max(1, row_bytes)) // sub * sub)
    if gen >= 7 and rows > 2 * sub:
        # v7x: aim for an even (>= 2) number of row blocks so both TensorCores
        # get equal work under CORE_PARALLEL.
        steps = max(2, pl.cdiv(rows, tm))
        steps += steps % 2
        tm = max(sub, _round_up(pl.cdiv(rows, steps), sub))
    if tm >= rows:
        tm = rows                          # block == full array dim is always legal
    n_steps = pl.cdiv(rows, tm)            # ragged last block: padded reads, masked writes

    x_spec_kwargs = {}
    if gen >= 7 and n_steps > 2:
        # Deeper input prefetch: at 3.2 TB/s each block's DMA is short, so a
        # third in-flight input buffer keeps the DMA queue full.
        # 8 MiB * (3 in + 2 out) = 40 MiB <= 48 MiB vmem limit.
        x_spec_kwargs["pipeline_mode"] = pl.Buffered(3)

    call_kwargs = {}
    if donate_input:
        # Only useful when the caller actually donates x at the jit boundary;
        # removes the full-size output HBM allocation (1R+1W traffic unchanged).
        call_kwargs["input_output_aliases"] = {1: 0}

    return pl.pallas_call(
        _scale_kernel,
        out_shape=jax.ShapeDtypeStruct((rows, cols), x2d.dtype),
        grid_spec=pltpu.PrefetchScalarGridSpec(
            num_scalar_prefetch=0,
            grid=(n_steps,),
            in_specs=[
                pl.BlockSpec(memory_space=pltpu.SMEM),                       # f32 scale scalar
                pl.BlockSpec((tm, cols), lambda i: (i, 0), **x_spec_kwargs),  # x row-block
            ],
            out_specs=pl.BlockSpec((tm, cols), lambda i: (i, 0)),
        ),
        compiler_params=_compiler_params(gen, n_steps),
        **call_kwargs,
    )(scale_f32, x2d)


def _scale_nd_fallback(x: jax.Array, scale_f32: jax.Array, *, gen: int) -> jax.Array:
    """Copy-free fallback for sizes not divisible by 128.

    Keeps the (possibly odd-sized) trailing two dims as full-extent block dims
    (always legal) and tiles over a flattened leading axis, so there is no
    pad / slice copy at all (old path cost ~3x HBM traffic).
    """
    shape = x.shape
    if x.ndim >= 3:
        lead = 1
        for d in shape[:-2]:
            lead *= d
        x3 = x.reshape(lead, shape[-2], shape[-1])
    elif x.ndim == 2:
        x3 = x.reshape(1, shape[0], shape[1])
    else:
        x3 = x.reshape(1, 1, -1)
    L, H, W = x3.shape
    itemsize = jnp.dtype(x.dtype).itemsize
    slab_bytes = max(1, H * W * itemsize)
    # TODO(synk): if a single trailing (H, W) slab alone exceeded VMEM this path
    # would need manual DMA; not expected for conv feature maps.
    bl = max(1, min(L, _target_block_bytes(gen) // slab_bytes))
    n_steps = pl.cdiv(L, bl)

    out3 = pl.pallas_call(
        _scale_kernel,
        out_shape=jax.ShapeDtypeStruct((L, H, W), x.dtype),
        grid_spec=pltpu.PrefetchScalarGridSpec(
            num_scalar_prefetch=0,
            grid=(n_steps,),
            in_specs=[
                pl.BlockSpec(memory_space=pltpu.SMEM),
                pl.BlockSpec((bl, H, W), lambda i: (i, 0, 0)),
            ],
            out_specs=pl.BlockSpec((bl, H, W), lambda i: (i, 0, 0)),
        ),
        compiler_params=_compiler_params(gen, n_steps),
    )(scale_f32, x3)
    return out3.reshape(shape)


def scale_layer(x: jax.Array, scale: jax.Array, *, donate_input: bool = False) -> jax.Array:
    """ScaleLayer forward: x * scale, where scale is a learnable shape-(1,) scalar."""
    orig_shape = x.shape
    n = x.size
    if n == 0:
        return x
    scale_f32 = jnp.asarray(scale, dtype=jnp.float32).reshape(1)
    gen = _tpu_generation()
    itemsize = jnp.dtype(x.dtype).itemsize
    sub = max(8, 32 // itemsize)

    divisors = [c for c in _COL_CANDIDATES if n % c == 0]
    if divisors:
        # Common aligned path: no padding / extra copies at all.
        cols = None
        if gen >= 7:
            # Prefer a width that leaves >= 2 sublane-aligned row blocks so both
            # v7x TensorCores can be fed.
            cols = next((c for c in divisors if n // c >= 2 * sub), None)
        if cols is None:
            # Otherwise, widest slab that still fills the 8 sublanes.
            cols = next((c for c in divisors if n // c >= 8), divisors[0])
        rows = n // cols
        out2d = _scale_2d(x.reshape(rows, cols), scale_f32, gen=gen,
                          donate_input=donate_input)
        return out2d.reshape(orig_shape)

    # Rare unaligned-size path.
    return _scale_nd_fallback(x, scale_f32, gen=gen)


if __name__ == "__main__":
    key = jax.random.PRNGKey(0)
    k1, k2, k3 = jax.random.split(key, 3)

    # NCHW input consistent with typical conv feature maps.
    x = jax.random.normal(k1, (2, 4, 16, 16), dtype=jnp.float32)

    # ScaleLayer(init_value=1.0) -> scale = [1.0]
    scale = jnp.array([1.0], dtype=jnp.float32)
    out = scale_layer(x, scale)
    jax.block_until_ready(out)
    assert out.shape == x.shape and out.dtype == x.dtype
    assert jnp.allclose(out, x, atol=1e-6), "mismatch vs reference (1.0)"

    # non-trivial scale value to actually exercise the multiply
    scale2 = jnp.array([0.37], dtype=jnp.float32)
    out2 = scale_layer(x, scale2)
    jax.block_until_ready(out2)
    assert jnp.allclose(out2, x * 0.37, atol=1e-6), "mismatch vs reference (0.37)"

    # bf16 input: exercises the native-dtype multiply and 16-row sublane multiple
    xb = jax.random.normal(k2, (2, 4, 16, 16), dtype=jnp.float32).astype(jnp.bfloat16)
    outb = scale_layer(xb, scale2)
    jax.block_until_ready(outb)
    refb = xb * scale2[0].astype(jnp.bfloat16)
    assert outb.dtype == jnp.bfloat16
    assert jnp.allclose(outb.astype(jnp.float32), refb.astype(jnp.float32), atol=1e-2), \
        "mismatch vs reference (bf16)"

    # unaligned total size: exercises the copy-free N-D fallback path
    x3 = jax.random.normal(k3, (2, 3, 17, 19), dtype=jnp.float32)
    out3 = scale_layer(x3, scale2)
    jax.block_until_ready(out3)
    assert jnp.allclose(out3, x3 * 0.37, atol=1e-6), "mismatch vs reference (unaligned)"

    print("KERNEL_OK")
</pallas_src>

<mosaic_0001>
module attributes {stable_mosaic.version = 11 : i64} {
  func.func @_scale_kernel(%arg0: i32, %arg1: memref<1xf32, #tpu.memory_space<smem>>, %arg2: memref<8x256xf32, #tpu.memory_space<vmem>>, %arg3: memref<8x256xf32, #tpu.memory_space<vmem>>) attributes {dimension_semantics = [#tpu.dimension_semantics<parallel>], iteration_bounds = array<i64: 1>, scalar_prefetch = 0 : i64, scratch_operands = 0 : i64, tpu.core_type = #tpu.core_type<tc>, window_params = [{transform_indices = @transform_0, window_bounds = array<i64: 1>}, {transform_indices = @transform_1, window_bounds = array<i64: 8, 256>}, {transform_indices = @transform_2, window_bounds = array<i64: 8, 256>}]} {
    %c0 = arith.constant 0 : index
    %0 = memref.load %arg1[%c0] : memref<1xf32, #tpu.memory_space<smem>>
    %c0_0 = arith.constant 0 : index
    %c0_1 = arith.constant 0 : index
    %1 = vector.load %arg2[%c0_0, %c0_1] : memref<8x256xf32, #tpu.memory_space<vmem>>, vector<8x256xf32>
    %2 = vector.broadcast %0 : f32 to vector<8x256xf32>
    %3 = arith.mulf %1, %2 : vector<8x256xf32>
    %c0_2 = arith.constant 0 : index
    %c0_3 = arith.constant 0 : index
    %4 = vector.load %arg3[%c0_2, %c0_3] : memref<8x256xf32, #tpu.memory_space<vmem>>, vector<8x256xf32>
    tpu.vector_store %arg3[%c0_2, %c0_3], %3 {strides = array<i32>} : memref<8x256xf32, #tpu.memory_space<vmem>>, vector<8x256xf32>,
    return
  }
  func.func @transform_0(%arg0: i32) -> i32 {
    %c0_i32 = arith.constant 0 : i32
    %c0_i32_0 = arith.constant 0 : i32
    return %c0_i32 : i32
  }
  func.func @transform_1(%arg0: i32) -> (i32, i32) {
    %c0_i32 = arith.constant 0 : i32
    %c0_i32_0 = arith.constant 0 : i32
    return %arg0, %c0_i32 : i32, i32
  }
  func.func @transform_2(%arg0: i32) -> (i32, i32) {
    %c0_i32 = arith.constant 0 : i32
    %c0_i32_0 = arith.constant 0 : i32
    return %arg0, %c0_i32 : i32, i32
  }
}

</mosaic_0001>

<bundles_post_ra>
// kernel: tpu_custom_call.1
= control target key start
LH: loop header
LB: loop body
LE: loop exit
PB: predicated region body
PF: predicated region fallthrough
CT: control target
= control target key end

     0   :  { %8 = vsyncpa [#allocation4], 0  ;;  %s120_s0 = inlined_call_operand.<no memory space> [shape: f32[1], index: 0, kind: input, shape index: {}]   ;;  %s121_s1 = inlined_call_operand.hbm [shape: f32[8,256], index: 1, kind: input, shape index: {}]   ;;  %s122_s2 = inlined_call_operand.hbm [shape: f32[8,256], index: 2, kind: output, shape index: {}]  }
   0x1   :  { %9 = vsyncpa [#allocation5], 0  ;;  %s94_s9 = smov [#allocation3]  }
   0x2   :  { %s18_s10 = sshll.u32 %s94_s9, 4  ;;  %s19_s10 = int_to_ptr.vmem [resolvable:$true] %s18_s10 }
   0x3   :  { %s58_s11 = scalar_lea.vmem %s19_s10, 256  ;;  %p63_p1 = scmp.lt.s32.totalorder %s19_s10, %s19_s10 }
   0x4   :  { %p59_p0 = scmp.ne.s32.totalorder %s19_s10, %s58_s11  ;;  %p64_p2 = scmp.lt.s32.totalorder %s58_s11, %s58_s11 }
   0x6   :  { %p65_p3 = por %p64_p2, %p63_p1 }
   0x8   :  { %p66_p4 = pnand %p65_p3, %p59_p0 }
   0xa   :  { %69 = shalt.err (!%p66_p4)
}
   0xb   :  { %21 = dma.hbm_to_vmem [thread:$0]  %s121_s1, 256, %s19_s10, [#allocation4]  }
   0xc   :  { %90 = dma.done.wait [#allocation4], 256  }
   0xd   :  { %91 = vsyncadd [#allocation4], 4294967040  ;;  %v28_v0 = vstv %s120_s0  ;;  %s95_s16 = smov [#allocation6]   ;;  %v26_v1 = vld [vmem:[#allocation3] sm:$0xff]  ;;  %v27_v2 = vld [vmem:[#allocation3 + $0x8] sm:$0xff] }
   0xe   :  { %s39_s17 = sshll.u32 %s95_s16, 4  ;;  %v29_v3 = vmul.f32 %v28_v0, %v26_v1  ;;  %v30_v4 = vmul.f32 %v28_v0, %v27_v2  ;;  %s40_s17 = int_to_ptr.vmem [resolvable:$true] %s39_s17 }
   0xf   :  { %s70_s18 = scalar_lea.vmem %s40_s17, 256  ;;  %p75_p6 = scmp.lt.s32.totalorder %s40_s17, %s40_s17 }
  0x10   :  { %31 = vst [vmem:[#allocation6] sm:$0xff] %v29_v3  ;;  %32 = vst [vmem:[#allocation6 + $0x8] sm:$0xff] %v30_v4  ;;  %p71_p5 = scmp.ne.s32.totalorder %s40_s17, %s70_s18  ;;  %p76_p7 = scmp.lt.s32.totalorder %s70_s18, %s70_s18 }
  0x12   :  { %p77_p8 = por %p76_p7, %p75_p6 }
  0x14   :  { %p78_p9 = pnand %p77_p8, %p71_p5 }
  0x16   :  { %81 = shalt.err (!%p78_p9)
}
  0x17   :  { %42 = dma.vmem_to_hbm [thread:$0]  %s40_s17, 256, %s122_s2, [#allocation5]  }
  0x18   :  { %92 = dma.done.wait [#allocation5], 256  }
  0x19   :  { %93 = vsyncadd [#allocation5], 4294967040 }
  0x1a   :  { %46 = vsyncpa [#allocation4], 1 }
  0x1b   :  { %47 = vsyncpa [#allocation5], 1 }

</bundles_post_ra>
